<compile_context>
chip_gen: v7x
topology: tpu7x:2x2x1
jax: 0.10.0
libtpu: 0.0.40
codegen_flags: <defaults>
</compile_context>

<pallas_src>
import functools
import math

import jax
import jax.numpy as jnp
from jax import lax
from jax.experimental import pallas as pl
from jax.experimental.pallas import tpu as pltpu


def _round_up(x, m):
    return ((x + m - 1) // m) * m


def _bayes_linear_kernel(x_ref, wmu_ref, wls_ref, weps_ref, b_ref, o_ref, acc_ref):
    k = pl.program_id(2)

    @pl.when(k == 0)
    def _():
        acc_ref[...] = jnp.zeros_like(acc_ref)

    # Reparameterisation trick on the (tn, tk) weight tile (VPU mul/add + EUP exp).
    w = wmu_ref[...] + jnp.exp(wls_ref[...]) * weps_ref[...]          # (tn, tk)

    # x @ w.T without materialising the transpose: contract x dim 1 with w dim 1.
    acc_ref[...] += lax.dot_general(
        x_ref[...], w,
        dimension_numbers=(((1,), (1,)), ((), ())),
        preferred_element_type=jnp.float32)

    @pl.when(k == pl.num_programs(2) - 1)
    def _():
        o_ref[...] = (acc_ref[...] + b_ref[...]).astype(o_ref.dtype)


@jax.jit
def bayes_linear_forward(x, weight_mu, weight_log_sigma, weight_eps,
                         bias_mu, bias_log_sigma, bias_eps):
    """x: (B, in), weight_*: (out, in), bias_*: (out,). Returns (B, out)."""
    B, in_f = x.shape
    out_f, _ = weight_mu.shape
    dtype = x.dtype

    # Tile sizes: modest f32 tiles that double-buffer comfortably inside the scoped
    # VMEM defaults of v5e (16 MiB), v6e (32 MiB) and v7x (32 MiB).
    tm = 256 if B >= 256 else _round_up(B, 8)
    tn = 512 if out_f >= 512 else _round_up(out_f, 128)
    tk = 512 if in_f >= 512 else _round_up(in_f, 128)

    B_p = _round_up(B, tm)
    out_p = _round_up(out_f, tn)
    in_p = _round_up(in_f, tk)

    # Zero padding is numerically inert:
    #   padded x columns multiply padded weight columns (both 0); padded output
    #   rows/cols are sliced off below; padded bias entries are 0.
    x_p = jnp.pad(x, ((0, B_p - B), (0, in_p - in_f)))
    wmu_p = jnp.pad(weight_mu, ((0, out_p - out_f), (0, in_p - in_f)))
    wls_p = jnp.pad(weight_log_sigma, ((0, out_p - out_f), (0, in_p - in_f)))
    wep_p = jnp.pad(weight_eps, ((0, out_p - out_f), (0, in_p - in_f)))

    # Bias reparameterisation is O(out_f): do it once in XLA, pass one lane-dense row.
    bias = bias_mu + jnp.exp(bias_log_sigma) * bias_eps
    bias_p = jnp.pad(bias, (0, out_p - out_f)).reshape(1, out_p)

    grid = (B_p // tm, out_p // tn, in_p // tk)

    out_padded = pl.pallas_call(
        _bayes_linear_kernel,
        out_shape=jax.ShapeDtypeStruct((B_p, out_p), dtype),
        grid_spec=pltpu.PrefetchScalarGridSpec(
            num_scalar_prefetch=0,
            grid=grid,
            in_specs=[
                pl.BlockSpec((tm, tk), lambda i, j, k: (i, k)),   # x
                pl.BlockSpec((tn, tk), lambda i, j, k: (j, k)),   # weight_mu
                pl.BlockSpec((tn, tk), lambda i, j, k: (j, k)),   # weight_log_sigma
                pl.BlockSpec((tn, tk), lambda i, j, k: (j, k)),   # weight_eps
                pl.BlockSpec((1, tn), lambda i, j, k: (0, j)),    # reparameterised bias
            ],
            out_specs=pl.BlockSpec((tm, tn), lambda i, j, k: (i, j)),
            scratch_shapes=[pltpu.VMEM((tm, tn), jnp.float32)],
        ),
        compiler_params=pltpu.CompilerParams(
            dimension_semantics=("parallel", "parallel", "arbitrary")),
    )(x_p, wmu_p, wls_p, wep_p, bias_p)

    return out_padded[:B, :out_f]


def bayes_linear_reference(x, weight_mu, weight_log_sigma, weight_eps,
                           bias_mu, bias_log_sigma, bias_eps):
    w = weight_mu + jnp.exp(weight_log_sigma) * weight_eps
    b = bias_mu + jnp.exp(bias_log_sigma) * bias_eps
    return x @ w.T + b


def _make_inputs(key, batch, in_features, out_features, prior_log_sigma):
    k_x, k_wmu, k_bmu, k_weps, k_beps = jax.random.split(key, 5)
    stdv = 1.0 / math.sqrt(in_features)
    weight_mu = jax.random.uniform(k_wmu, (out_features, in_features),
                                   jnp.float32, -stdv, stdv)
    weight_log_sigma = jnp.full((out_features, in_features), prior_log_sigma,
                                jnp.float32)
    bias_mu = jax.random.uniform(k_bmu, (out_features,), jnp.float32, -stdv, stdv)
    bias_log_sigma = jnp.full((out_features,), prior_log_sigma, jnp.float32)
    # weight_eps / bias_eps buffers are None in the module -> fresh standard-normal
    # noise at forward time; drawn deterministically here with jax.random.
    weight_eps = jax.random.normal(k_weps, (out_features, in_features), jnp.float32)
    bias_eps = jax.random.normal(k_beps, (out_features,), jnp.float32)
    x = jax.random.normal(k_x, (batch, in_features), jnp.float32)
    return x, weight_mu, weight_log_sigma, weight_eps, bias_mu, bias_log_sigma, bias_eps


if __name__ == "__main__":
    prior_mu = 0.0
    prior_sigma = 0.1
    prior_log_sigma = math.log(prior_sigma)

    key = jax.random.PRNGKey(0)
    k1, k2 = jax.random.split(key, 2)

    # Case 1: module-scale shapes (batch=8, in=32, out=32) -> single-tile grid.
    args1 = _make_inputs(k1, batch=8, in_features=32, out_features=32,
                         prior_log_sigma=prior_log_sigma)
    out1 = jax.block_until_ready(bayes_linear_forward(*args1))
    ref1 = bayes_linear_reference(*args1)
    assert out1.shape == (8, 32)
    assert jnp.allclose(out1, ref1, atol=1e-5, rtol=1e-5), "case 1 mismatch vs reference"

    # Case 2: exercises padding + multi-step K reduction (grid K dim > 1) cheaply.
    args2 = _make_inputs(k2, batch=16, in_features=640, out_features=200,
                         prior_log_sigma=prior_log_sigma)
    out2 = jax.block_until_ready(bayes_linear_forward(*args2))
    ref2 = bayes_linear_reference(*args2)
    assert out2.shape == (16, 200)
    assert jnp.allclose(out2, ref2, atol=1e-4, rtol=1e-5), "case 2 mismatch vs reference"

    print("KERNEL_OK")
</pallas_src>

<mosaic_0001>
module attributes {stable_mosaic.version = 11 : i64} {
  func.func @_bayes_linear_kernel(%arg0: i32, %arg1: i32, %arg2: i32, %arg3: memref<8x128xf32, #tpu.memory_space<vmem>>, %arg4: memref<128x128xf32, #tpu.memory_space<vmem>>, %arg5: memref<128x128xf32, #tpu.memory_space<vmem>>, %arg6: memref<128x128xf32, #tpu.memory_space<vmem>>, %arg7: memref<1x128xf32, #tpu.memory_space<vmem>>, %arg8: memref<8x128xf32, #tpu.memory_space<vmem>>, %arg9: memref<8x128xf32, #tpu.memory_space<vmem>>) attributes {dimension_semantics = [#tpu.dimension_semantics<parallel>, #tpu.dimension_semantics<parallel>, #tpu.dimension_semantics<arbitrary>], iteration_bounds = array<i64: 1, 1, 1>, scalar_prefetch = 0 : i64, scratch_operands = 1 : i64, tpu.core_type = #tpu.core_type<tc>, window_params = [{transform_indices = @transform_0, window_bounds = array<i64: 8, 128>}, {transform_indices = @transform_1, window_bounds = array<i64: 128, 128>}, {transform_indices = @transform_2, window_bounds = array<i64: 128, 128>}, {transform_indices = @transform_3, window_bounds = array<i64: 128, 128>}, {transform_indices = @transform_4, window_bounds = array<i64: 1, 128>}, {transform_indices = @transform_5, window_bounds = array<i64: 8, 128>}]} {
    %c0_i32 = arith.constant 0 : i32
    %0 = arith.cmpi eq, %arg2, %c0_i32 : i32
    %1 = arith.extui %0 : i1 to i32
    %c0_i32_0 = arith.constant 0 : i32
    %2 = arith.cmpi ne, %1, %c0_i32_0 : i32
    scf.if %2 {
      %cst_14 = arith.constant 0.000000e+00 : f32
      %17 = vector.broadcast %cst_14 : f32 to vector<8x128xf32>
      %c0_15 = arith.constant 0 : index
      %c0_16 = arith.constant 0 : index
      %18 = vector.load %arg9[%c0_15, %c0_16] : memref<8x128xf32, #tpu.memory_space<vmem>>, vector<8x128xf32>
      tpu.vector_store %arg9[%c0_15, %c0_16], %17 {strides = array<i32>} : memref<8x128xf32, #tpu.memory_space<vmem>>, vector<8x128xf32>,
    } else {
    }
    %c0 = arith.constant 0 : index
    %c0_1 = arith.constant 0 : index
    %3 = vector.load %arg4[%c0, %c0_1] : memref<128x128xf32, #tpu.memory_space<vmem>>, vector<128x128xf32>
    %c0_2 = arith.constant 0 : index
    %c0_3 = arith.constant 0 : index
    %4 = vector.load %arg5[%c0_2, %c0_3] : memref<128x128xf32, #tpu.memory_space<vmem>>, vector<128x128xf32>
    %5 = math.exp %4 : vector<128x128xf32>
    %c0_4 = arith.constant 0 : index
    %c0_5 = arith.constant 0 : index
    %6 = vector.load %arg6[%c0_4, %c0_5] : memref<128x128xf32, #tpu.memory_space<vmem>>, vector<128x128xf32>
    %7 = arith.mulf %5, %6 : vector<128x128xf32>
    %8 = arith.addf %3, %7 : vector<128x128xf32>
    %c0_6 = arith.constant 0 : index
    %c0_7 = arith.constant 0 : index
    %9 = vector.load %arg9[%c0_6, %c0_7] : memref<8x128xf32, #tpu.memory_space<vmem>>, vector<8x128xf32>
    %c0_8 = arith.constant 0 : index
    %c0_9 = arith.constant 0 : index
    %10 = vector.load %arg3[%c0_8, %c0_9] : memref<8x128xf32, #tpu.memory_space<vmem>>, vector<8x128xf32>
    %cst = arith.constant dense<0.000000e+00> : vector<8x128xf32>
    %11 = tpu.matmul %10, %8, %cst {dimension_numbers = #tpu.dot_dimension_numbers<[1], [1], [0], [0], [0, 0, 1, 0], [], []>} : vector<8x128xf32>, vector<128x128xf32>, vector<8x128xf32> -> vector<8x128xf32>
    %12 = arith.addf %9, %11 : vector<8x128xf32>
    %c0_10 = arith.constant 0 : index
    %c0_11 = arith.constant 0 : index
    %13 = vector.load %arg9[%c0_10, %c0_11] : memref<8x128xf32, #tpu.memory_space<vmem>>, vector<8x128xf32>
    tpu.vector_store %arg9[%c0_10, %c0_11], %12 {strides = array<i32>} : memref<8x128xf32, #tpu.memory_space<vmem>>, vector<8x128xf32>,
    %c0_i32_12 = arith.constant 0 : i32
    %14 = arith.cmpi eq, %arg2, %c0_i32_12 : i32
    %15 = arith.extui %14 : i1 to i32
    %c0_i32_13 = arith.constant 0 : i32
    %16 = arith.cmpi ne, %15, %c0_i32_13 : i32
    scf.if %16 {
      %c0_14 = arith.constant 0 : index
      %c0_15 = arith.constant 0 : index
      %17 = vector.load %arg9[%c0_14, %c0_15] : memref<8x128xf32, #tpu.memory_space<vmem>>, vector<8x128xf32>
      %c0_16 = arith.constant 0 : index
      %c0_17 = arith.constant 0 : index
      %18 = vector.load %arg7[%c0_16, %c0_17] : memref<1x128xf32, #tpu.memory_space<vmem>>, vector<1x128xf32>
      %19 = vector.broadcast %18 : vector<1x128xf32> to vector<8x128xf32>
      %20 = arith.addf %17, %19 : vector<8x128xf32>
      %c0_18 = arith.constant 0 : index
      %c0_19 = arith.constant 0 : index
      %21 = vector.load %arg8[%c0_18, %c0_19] : memref<8x128xf32, #tpu.memory_space<vmem>>, vector<8x128xf32>
      tpu.vector_store %arg8[%c0_18, %c0_19], %20 {strides = array<i32>} : memref<8x128xf32, #tpu.memory_space<vmem>>, vector<8x128xf32>,
    } else {
    }
    return
  }
  func.func @transform_0(%arg0: i32, %arg1: i32, %arg2: i32) -> (i32, i32) {
    %c0_i32 = arith.constant 0 : i32
    return %arg0, %arg2 : i32, i32
  }
  func.func @transform_1(%arg0: i32, %arg1: i32, %arg2: i32) -> (i32, i32) {
    %c0_i32 = arith.constant 0 : i32
    return %arg1, %arg2 : i32, i32
  }
  func.func @transform_2(%arg0: i32, %arg1: i32, %arg2: i32) -> (i32, i32) {
    %c0_i32 = arith.constant 0 : i32
    return %arg1, %arg2 : i32, i32
  }
  func.func @transform_3(%arg0: i32, %arg1: i32, %arg2: i32) -> (i32, i32) {
    %c0_i32 = arith.constant 0 : i32
    return %arg1, %arg2 : i32, i32
  }
  func.func @transform_4(%arg0: i32, %arg1: i32, %arg2: i32) -> (i32, i32) {
    %c0_i32 = arith.constant 0 : i32
    %c0_i32_0 = arith.constant 0 : i32
    return %c0_i32, %arg1 : i32, i32
  }
  func.func @transform_5(%arg0: i32, %arg1: i32, %arg2: i32) -> (i32, i32) {
    %c0_i32 = arith.constant 0 : i32
    return %arg0, %arg1 : i32, i32
  }
}

</mosaic_0001>

<bundles_post_ra>
// kernel: bayes_linear_forward.1
= control target key start
LH: loop header
LB: loop body
LE: loop exit
PB: predicated region body
PF: predicated region fallthrough
CT: control target
= control target key end

     0   :  { %v376_v1 = vmov 0.0|0.0   ;;  %vm377_vm0 = vmmov 0   ;;  %v378_v4 = vmov 0.0   ;;  %s580_s0 = inlined_call_operand.vmem [shape: f32[8,128], index: 0, kind: input, shape index: {}]   ;;  %s581_s1 = inlined_call_operand.vmem [shape: f32[128,128], index: 1, kind: input, shape index: {}]   ;;  %s582_s2 = inlined_call_operand.vmem [shape: f32[128,128], index: 2, kind: input, shape index: {}]   ;;  %s583_s3 = inlined_call_operand.vmem [shape: f32[128,128], index: 3, kind: input, shape index: {}]   ;;  %s584_s4 = inlined_call_operand.vmem [shape: f32[1,128], index: 4, kind: input, shape index: {}]   ;;  %s585_s5 = inlined_call_operand.hbm [shape: f32[8,128], index: 5, kind: output, shape index: {}]  }
   0x1   :  { %v42_v0 = vld [vmem:[%s582_s2] sm:$0xff]  ;;  %292 = vmatprep.subr.bf16.mxu0 %v376_v1  ;;  %v43_v2 = vld [vmem:[%s582_s2 + $0x8] sm:$0xff]  ;;  %289 = vmatprep.mubr.msk.f32.mxu0 %vm377_vm0, %v378_v4  ;;  %v44_v6 = vld [vmem:[%s582_s2 + $0x10] sm:$0xff] }
   0x2   :  { %v58_v3 = vmul.f32 1.442695, %v42_v0  ;;  %v60_v5 = vmul.f32 1.442695, %v43_v2  ;;  %v45_v7 = vld [vmem:[%s582_s2 + $0x18] sm:$0xff]  ;;  %v46_v10 = vld [vmem:[%s582_s2 + $0x20] sm:$0xff] }
   0x3   :  { %v62_v8 = vmul.f32 1.442695, %v44_v6  ;;  %v64_v9 = vmul.f32 1.442695, %v45_v7  ;;  %v47_v11 = vld [vmem:[%s582_s2 + $0x28] sm:$0xff]  ;;  %v90_v14 = vld [vmem:[%s583_s3] sm:$0xff] }
   0x4   :  { %320 = vpow2.f32 %v58_v3  ;;  %v66_v12 = vmul.f32 1.442695, %v46_v10  ;;  %v68_v13 = vmul.f32 1.442695, %v47_v11  ;;  %v91_v15 = vld [vmem:[%s583_s3 + $0x8] sm:$0xff]  ;;  %v48_v16 = vld [vmem:[%s582_s2 + $0x30] sm:$0xff] }
   0x5   :  { %322 = vpow2.f32 %v60_v5  ;;  %v26_v18 = vld [vmem:[%s581_s1] sm:$0xff]  ;;  %v49_v19 = vld [vmem:[%s582_s2 + $0x38] sm:$0xff]  ;;  %v27_v21 = vld [vmem:[%s581_s1 + $0x8] sm:$0xff]  ;;  %v70_v27 = vmul.f32 1.442695, %v48_v16 }
   0x6   :  { %324 = vpow2.f32 %v62_v8  ;;  %v92_v23 = vld [vmem:[%s583_s3 + $0x10] sm:$0xff]  ;;  %v93_v24 = vld [vmem:[%s583_s3 + $0x18] sm:$0xff]  ;;  %v72_v30 = vmul.f32 1.442695, %v49_v19 }
   0x7   :  { %326 = vpow2.f32 %v64_v9 }
   0x8   :  { %328 = vpow2.f32 %v66_v12 }
   0x9   :  { %330 = vpow2.f32 %v68_v13 }
   0xe   :  { %v321_v17 = vpop.eup %320 }
   0xf   :  { %v323_v20 = vpop.eup %322  ;;  %v106_v22 = vmul.f32 %v321_v17, %v90_v14 }
  0x10   :  { %v325_v25 = vpop.eup %324  ;;  %v107_v26 = vmul.f32 %v323_v20, %v91_v15 }
  0x11   :  { %v327_v28 = vpop.eup %326  ;;  %v122_v29 = vadd.f32 %v106_v22, %v26_v18 }
  0x12   :  { %10 = vsyncpa [#allocation4], 0  ;;  %v123_v31 = vadd.f32 %v107_v26, %v27_v21  ;;  %v108_v32 = vmul.f32 %v325_v25, %v92_v23  ;;  %v109_v33 = vmul.f32 %v327_v28, %v93_v24  ;;  %v28_v34 = vld [vmem:[%s581_s1 + $0x10] sm:$0xff]  ;;  %v29_v35 = vld [vmem:[%s581_s1 + $0x18] sm:$0xff]  ;;  %332 = vpow2.f32 %v70_v27  ;;  %v329_v38 = vpop.eup %328  ;;  %s379_s16 = smov [#allocation3]  }
  0x13   :  { %334 = vpow2.f32 %v72_v30  ;;  %v50_v37 = vld [vmem:[%s582_s2 + $0x40] sm:$0xff]  ;;  %v51_v41 = vld [vmem:[%s582_s2 + $0x48] sm:$0xff]  ;;  %v331_v42 = vpop.eup %330  ;;  %v52_v52 = vld [vmem:[%s582_s2 + $0x50] sm:$0xff]  ;;  %s231_s17 = sshll.u32 %s379_s16, 4  ;;  %s232_s17 = int_to_ptr.vmem [resolvable:$true] %s231_s17 }
  0x14   :  { %v293_v36 = vpack.c.bf16 %v123_v31, %v122_v29  ;;  %v124_v39 = vadd.f32 %v108_v32, %v28_v34  ;;  %v125_v40 = vadd.f32 %v109_v33, %v29_v35  ;;  %v94_v43 = vld [vmem:[%s583_s3 + $0x20] sm:$0xff]  ;;  %v95_v44 = vld [vmem:[%s583_s3 + $0x28] sm:$0xff]  ;;  %v74_v45 = vmul.f32 1.442695, %v50_v37  ;;  %v53_v56 = vld [vmem:[%s582_s2 + $0x58] sm:$0xff]  ;;  %p357_p1 = scmp.lt.s32.totalorder %s232_s17, %s232_s17 }
  0x15   :  { %v76_v46 = vmul.f32 1.442695, %v51_v41  ;;  %v110_v48 = vmul.f32 %v329_v38, %v94_v43  ;;  %v111_v49 = vmul.f32 %v331_v42, %v95_v44  ;;  %v30_v50 = vld [vmem:[%s581_s1 + $0x20] sm:$0xff]  ;;  %v31_v51 = vld [vmem:[%s581_s1 + $0x28] sm:$0xff]  ;;  %v96_v58 = vld [vmem:[%s583_s3 + $0x30] sm:$0xff] }
  0x16   :  { %294 = vmatpush3.bf16.xpose.msra.mxu0 %v293_v36  ;;  %v296_v47 = vpack.c.bf16 %v125_v40, %v124_v39  ;;  %336 = vpow2.f32 %v74_v45  ;;  %v97_v59 = vld [vmem:[%s583_s3 + $0x38] sm:$0xff]  ;;  %v78_v60 = vmul.f32 1.442695, %v52_v52  ;;  %v80_v61 = vmul.f32 1.442695, %v53_v56  ;;  %v32_v2 = vld [vmem:[%s581_s1 + $0x30] sm:$0xff] }
  0x17   :  { %295 = vmatprep.subr.bf16.mxu0 %v376_v1  ;;  %338 = vpow2.f32 %v76_v46  ;;  %v126_v54 = vadd.f32 %v110_v48, %v30_v50  ;;  %v127_v55 = vadd.f32 %v111_v49, %v31_v51  ;;  %v33_v3 = vld [vmem:[%s581_s1 + $0x38] sm:$0xff]  ;;  %v54_v4 = vld [vmem:[%s582_s2 + $0x60] sm:$0xff]  ;;  %v55_v8 = vld [vmem:[%s582_s2 + $0x68] sm:$0xff] }
  0x18   :  { %340 = vpow2.f32 %v78_v60  ;;  %v98_v10 = vld [vmem:[%s583_s3 + $0x40] sm:$0xff]  ;;  %v99_v11 = vld [vmem:[%s583_s3 + $0x48] sm:$0xff]  ;;  %v82_v12 = vmul.f32 1.442695, %v54_v4  ;;  %v84_v13 = vmul.f32 1.442695, %v55_v8 }
  0x19   :  { %v299_v62 = vpack.c.bf16 %v127_v55, %v126_v54  ;;  %342 = vpow2.f32 %v80_v61  ;;  %v34_v17 = vld [vmem:[%s581_s1 + $0x40] sm:$0xff]  ;;  %v35_v18 = vld [vmem:[%s581_s1 + $0x48] sm:$0xff]  ;;  %v56_v19 = vld [vmem:[%s582_s2 + $0x70] sm:$0xff] }
  0x1a   :  { %344 = vpow2.f32 %v82_v12  ;;  %v57_v23 = vld [vmem:[%s582_s2 + $0x78] sm:$0xff]  ;;  %v100_v25 = vld [vmem:[%s583_s3 + $0x50] sm:$0xff]  ;;  %v86_v27 = vmul.f32 1.442695, %v56_v19  ;;  %v102_v38 = vld [vmem:[%s583_s3 + $0x60] sm:$0xff] }
  0x1b   :  { %346 = vpow2.f32 %v84_v13  ;;  %v101_v26 = vld [vmem:[%s583_s3 + $0x58] sm:$0xff]  ;;  %v88_v28 = vmul.f32 1.442695, %v57_v23  ;;  %v36_v32 = vld [vmem:[%s581_s1 + $0x50] sm:$0xff]  ;;  %v103_v39 = vld [vmem:[%s583_s3 + $0x68] sm:$0xff] }
  0x1c   :  { %v333_v53 = vpop.eup %332  ;;  %v37_v33 = vld [vmem:[%s581_s1 + $0x58] sm:$0xff]  ;;  %348 = vpow2.f32 %v86_v27  ;;  %v38_v43 = vld [vmem:[%s581_s1 + $0x60] sm:$0xff]  ;;  %v39_v44 = vld [vmem:[%s581_s1 + $0x68] sm:$0xff] }
  0x1d   :  { %v335_v57 = vpop.eup %334  ;;  %v112_v63 = vmul.f32 %v333_v53, %v96_v58  ;;  %350 = vpow2.f32 %v88_v28  ;;  %v104_v49 = vld [vmem:[%s583_s3 + $0x70] sm:$0xff]  ;;  %v105_v50 = vld [vmem:[%s583_s3 + $0x78] sm:$0xff]  ;;  %v239_v60 = vld [vmem:[%s584_s4] ss:$0 sm:$0xff] }
  0x1e   :  { %297 = vmatpush3.bf16.xpose.msra.mxu0 %v296_v47  ;;  %v113_v0 = vmul.f32 %v335_v57, %v97_v59  ;;  %v40_v54 = vld [vmem:[%s581_s1 + $0x70] sm:$0xff]  ;;  %v41_v55 = vld [vmem:[%s581_s1 + $0x78] sm:$0xff]  ;;  %v139_v59 = vld [vmem:[%s580_s0] sm:$0xff]  ;;  %s352_s1 = scalar_lea.vmem %s232_s17, 128 }
  0x1f   :  { %298 = vmatprep.subr.bf16.mxu0 %v376_v1  ;;  %v128_v6 = vadd.f32 %v112_v63, %v32_v2  ;;  %p353_p0 = scmp.ne.s32.totalorder %s232_s17, %s352_s1  ;;  %p358_p2 = scmp.lt.s32.totalorder %s352_s1, %s352_s1 }
  0x20   :  { %v337_v5 = vpop.eup %336  ;;  %v129_v7 = vadd.f32 %v113_v0, %v33_v3 }
  0x21   :  { %v339_v9 = vpop.eup %338  ;;  %v114_v15 = vmul.f32 %v337_v5, %v98_v10  ;;  %p359_p3 = por %p358_p2, %p357_p1 }
  0x22   :  { %v302_v14 = vpack.c.bf16 %v129_v7, %v128_v6  ;;  %v115_v16 = vmul.f32 %v339_v9, %v99_v11  ;;  %v341_v20 = vpop.eup %340 }
  0x23   :  { %v130_v21 = vadd.f32 %v114_v15, %v34_v17  ;;  %v343_v24 = vpop.eup %342  ;;  %v116_v30 = vmul.f32 %v341_v20, %v100_v25  ;;  %p360_p4 = pnand %p359_p3, %p353_p0 }
  0x24   :  { %v131_v22 = vadd.f32 %v115_v16, %v35_v18  ;;  %v117_v31 = vmul.f32 %v343_v24, %v101_v26  ;;  %v345_v34 = vpop.eup %344 }
  0x25   :  { %v132_v35 = vadd.f32 %v116_v30, %v36_v32  ;;  %v347_v37 = vpop.eup %346  ;;  %v118_v41 = vmul.f32 %v345_v34, %v102_v38 }
  0x26   :  { %300 = vmatpush3.bf16.xpose.msra.mxu0 %v299_v62  ;;  %v305_v29 = vpack.c.bf16 %v131_v22, %v130_v21  ;;  %v133_v36 = vadd.f32 %v117_v31, %v37_v33  ;;  %v119_v42 = vmul.f32 %v347_v37, %v103_v39  ;;  %v349_v45 = vpop.eup %348 }
  0x27   :  { %301 = vmatprep.subr.bf16.mxu0 %v376_v1  ;;  %v134_v46 = vadd.f32 %v118_v41, %v38_v43  ;;  %v351_v48 = vpop.eup %350  ;;  %v120_v52 = vmul.f32 %v349_v45, %v104_v49 }
  0x28   :  { %v308_v40 = vpack.c.bf16 %v133_v36, %v132_v35  ;;  %v135_v47 = vadd.f32 %v119_v42, %v39_v44  ;;  %v121_v53 = vmul.f32 %v351_v48, %v105_v50 }
  0x29   :  { %v136_v56 = vadd.f32 %v120_v52, %v40_v54 }
  0x2a   :  { %v311_v51 = vpack.c.bf16 %v135_v47, %v134_v46  ;;  %v137_v57 = vadd.f32 %v121_v53, %v41_v55 }
  0x2c   :  { %v314_v58 = vpack.c.bf16 %v137_v57, %v136_v56 }
  0x2e   :  { %303 = vmatpush3.bf16.xpose.msra.mxu0 %v302_v14 }
  0x2f   :  { %304 = vmatprep.subr.bf16.mxu0 %v376_v1 }
  0x36   :  { %306 = vmatpush3.bf16.xpose.msra.mxu0 %v305_v29 }
  0x37   :  { %307 = vmatprep.subr.bf16.mxu0 %v376_v1 }
  0x3e   :  { %309 = vmatpush3.bf16.xpose.msra.mxu0 %v308_v40 }
  0x3f   :  { %310 = vmatprep.subr.bf16.mxu0 %v376_v1 }
  0x46   :  { %312 = vmatpush3.bf16.xpose.msra.mxu0 %v311_v51 }
  0x47   :  { %313 = vmatprep.subr.bf16.mxu0 %v376_v1 }
  0x4e   :  { %315 = vmatpush3.bf16.xpose.msra.mxu0 %v314_v58 }
  0x55   :  { %290 = vmatmul.mubr.f32.vlgmr.msra.gmra.mrb[0].mxu0 %v139_v59 }
 0x128   :  { %v206_v61 = vpop.f32.mrb[0].mxu0 }
 0x129   :  { %v223_v62 = vadd.f32 %v239_v60, %v206_v61  ;;  %v291_v63 = vpop.f32.mrb[1].mxu0 }
 0x12b   :  { %224 = vst [vmem:[#allocation3] sm:$0xff] %v223_v62 }
 0x12c   :  { %363 = shalt.err (!%p360_p4)
}
 0x12d   :  { %s364_s19 = scalar_lea.hbm %s585_s5, 128 }
 0x12e   :  { %p365_p5 = scmp.ne.s32.totalorder %s585_s5, %s364_s19  ;;  %p368_p6 = scmp.lt.u32.totalorder %s364_s19, %s585_s5 }
 0x130   :  { %p370_p7 = pnand %p368_p6, %p365_p5 }
 0x132   :  { %373 = shalt.err (!%p370_p7)
}
 0x133   :  { %234 = dma.vmem_to_hbm [thread:$0]  %s232_s17, 128, %s585_s5, [#allocation4]  }
 0x134   :  { %374 = dma.done.wait [#allocation4], 128  }
 0x135   :  { %375 = vsyncadd [#allocation4], 4294967168 }
 0x136   :  { %238 = vsyncpa [#allocation4], 1 }

</bundles_post_ra>
